<compile_context>
chip_gen: v7x
topology: tpu7x:2x2x1
jax: 0.10.0
libtpu: 0.0.40
codegen_flags: <defaults>
</compile_context>

<pallas_src>
import math

import jax
import jax.numpy as jnp
import numpy as np
from jax import lax
from jax.experimental import pallas as pl
from jax.experimental.pallas import tpu as pltpu

_STATIC_HEAD_UNROLL = 8   # <= this many heads: static unroll, else fori_loop


# ----------------------------------------------------------------------------
# Per-generation configuration
# ----------------------------------------------------------------------------
def _vmem_capacity_bytes():
    try:
        return int(pltpu.get_tpu_info().vmem_capacity_bytes)
    except Exception:
        return None


def _tpu_config():
    cap = _vmem_capacity_bytes()
    if cap is not None and cap >= 96 * 2**20:
        # v4 / v5e / v6e: 128 MiB physical VMEM -> big tiles, big scoped budget.
        return {"vmem_limit": 104 * 2**20, "tq": 512, "tkv": 512}
    if cap is not None:
        # v7x-class (64 MiB) or smaller: conservative tiles, leave headroom
        # for Mosaic internal scratch.
        return {"vmem_limit": max(cap - 16 * 2**20, cap // 2),
                "tq": 256, "tkv": 256}
    # Unknown backend: conservative.
    return {"vmem_limit": 48 * 2**20, "tq": 256, "tkv": 256}


def _fit_tile(dim, target):
    """Largest multiple-of-8 divisor of `dim` that is <= target (dim if small)."""
    if dim <= target:
        return dim
    t = (target // 8) * 8
    while t >= 8:
        if dim % t == 0:
            return t
        t -= 8
    # TODO(synk): pad + mask (pl.cdiv grid) instead of whole-dim fallback for
    # pathological (e.g. prime) dims; realistic StepVideo shapes never hit this.
    return dim


# ----------------------------------------------------------------------------
# Kernel 1: tiled matmul  y = x @ w  with f32 accumulation over the K grid axis
# ----------------------------------------------------------------------------
def _matmul_kernel(x_ref, w_ref, o_ref, acc_ref):
    @pl.when(pl.program_id(2) == 0)
    def _():
        acc_ref[...] = jnp.zeros(acc_ref.shape, acc_ref.dtype)

    acc_ref[...] += jnp.dot(x_ref[...], w_ref[...],
                            preferred_element_type=jnp.float32)

    @pl.when(pl.program_id(2) == pl.num_programs(2) - 1)
    def _():
        o_ref[...] = acc_ref[...].astype(o_ref.dtype)


def pallas_matmul(x, w, *, tm=512, tn=1024, tk=512, vmem_limit=48 * 2**20):
    m, k = x.shape
    k2, n = w.shape
    assert k == k2
    tn_eff = _fit_tile(n, tn)
    tk_eff = _fit_tile(k, tk)

    # M = B*S may not divide the target tile: pad rows (rows are independent).
    m_pad = m
    if m <= tm:
        tm_eff = m
        if m % 8:
            m_pad = ((m + 7) // 8) * 8
            tm_eff = m_pad
    else:
        tm_eff = _fit_tile(m, tm)
        if tm_eff < 256:
            tm_eff = tm
            m_pad = pl.cdiv(m, tm) * tm
    if m_pad != m:
        x = jnp.pad(x, ((0, m_pad - m), (0, 0)))

    out = pl.pallas_call(
        _matmul_kernel,
        out_shape=jax.ShapeDtypeStruct((m_pad, n), x.dtype),
        grid=(m_pad // tm_eff, n // tn_eff, k // tk_eff),
        in_specs=[
            pl.BlockSpec((tm_eff, tk_eff), lambda i, j, kk: (i, kk)),
            pl.BlockSpec((tk_eff, tn_eff), lambda i, j, kk: (kk, j)),
        ],
        out_specs=pl.BlockSpec((tm_eff, tn_eff), lambda i, j, kk: (i, j)),
        scratch_shapes=[pltpu.VMEM((tm_eff, tn_eff), jnp.float32)],
        compiler_params=pltpu.CompilerParams(
            dimension_semantics=("parallel", "parallel", "arbitrary"),
            vmem_limit_bytes=vmem_limit),
    )(x, w)
    return out if m_pad == m else out[:m]


# ----------------------------------------------------------------------------
# RoPE column permutation helpers (parameter-prep time, applied once)
# ----------------------------------------------------------------------------
def _rope_head_perm(rope_split):
    """Within-head permutation grouping all chunk first-halves then all
    second-halves, so neox rotate-half becomes one full-width lane roll."""
    first, second = [], []
    off = 0
    for c in rope_split:
        h = c // 2
        first.extend(range(off, off + h))
        second.extend(range(off + h, off + c))
        off += c
    return np.asarray(first + second, dtype=np.int32)


def _wqkv_column_perm(n_heads, head_dim, head_perm):
    """Column permutation for the [in, 3*hidden] wqkv weight:
       (a) groups outputs as [all-q | all-k | all-v] with a flat per-head
           layout, and (b) applies the rope permutation to q and k columns."""
    d = head_dim
    ident = np.arange(d, dtype=np.int32)
    cols = []
    for part, perm in ((0, head_perm), (1, head_perm), (2, ident)):
        for h in range(n_heads):
            cols.append(h * 3 * d + part * d + perm)
    return np.concatenate(cols)


# ----------------------------------------------------------------------------
# Kernel 2: fused RMSNorm + rope + flash attention (non-causal, online softmax)
#   inputs: xqkv [B, S, 3*hidden] laid out [q | k | v], q/k pre-permuted.
#   grid = (B, S//tq, S//tkv); kv axis innermost / "arbitrary".
# ----------------------------------------------------------------------------
def _make_fused_attn_kernel(n_heads, head_dim, eps, q_scale, compute_dtype):
    half = head_dim // 2

    def kernel(q_ref, k_ref, v_ref, qg_ref, kg_ref,
               cos_q_ref, sin_q_ref, cos_k_ref, sin_k_ref,
               o_ref, qn_sc, m_sc, l_sc, acc_sc):
        ki = pl.program_id(2)

        def norm_rope(x, gamma, cos_t, sin_t):
            # StepVideoRMSNorm (f32 stats, cast back, * gamma) + neox rotary.
            # Columns are pre-permuted so rotate-half is one XLU roll; the +/-
            # sign is folded into sin_t.
            xf = x.astype(jnp.float32)
            ms = jnp.mean(xf * xf, axis=-1, keepdims=True)
            nrm = (xf * lax.rsqrt(ms + eps)).astype(compute_dtype) * gamma
            return nrm * cos_t + pltpu.roll(nrm, half, axis=1) * sin_t

        def run_heads(body):
            # body(h, lane_offset).  Small head counts: static unroll (cheap,
            # bounded pressure).  Production head counts (32-48): fori_loop
            # with 128-aligned dynamic lane slices bounds vreg / spill-VMEM
            # pressure and keeps code size / compile time sane.
            if n_heads <= _STATIC_HEAD_UNROLL:
                for h in range(n_heads):
                    body(h, h * head_dim)
            else:
                def wrapped(h, carry):
                    body(h, pl.multiple_of(h * head_dim, head_dim))
                    return carry
                lax.fori_loop(0, n_heads, wrapped, 0)

        # --- first kv step of this (batch, q-block): init stats, cache q -----
        @pl.when(ki == 0)
        def _():
            m_sc[...] = jnp.full(m_sc.shape, -jnp.inf, dtype=m_sc.dtype)
            l_sc[...] = jnp.zeros(l_sc.shape, dtype=l_sc.dtype)
            acc_sc[...] = jnp.zeros(acc_sc.shape, dtype=acc_sc.dtype)
            cos_q = cos_q_ref[...]
            sin_q = sin_q_ref[...]
            qg = qg_ref[...]

            def q_body(h, lo):
                qh = q_ref[0, :, pl.ds(lo, head_dim)]           # (tq, D)
                qn = norm_rope(qh, qg, cos_q, sin_q) * q_scale  # softmax scale folded in
                qn_sc[:, pl.ds(lo, head_dim)] = qn.astype(qn_sc.dtype)

            run_heads(q_body)

        # --- online softmax over this kv block, all heads --------------------
        cos_k = cos_k_ref[...]
        sin_k = sin_k_ref[...]
        kg = kg_ref[...]

        def head_body(h, lo):
            qh = qn_sc[:, pl.ds(lo, head_dim)]                   # (tq, D)
            kh = norm_rope(k_ref[0, :, pl.ds(lo, head_dim)], kg, cos_k, sin_k)
            vh = v_ref[0, :, pl.ds(lo, head_dim)]                # (tkv, D)
            # Contract D directly; no materialized transpose.  (QK^T only
            # half-fills the 256-deep MXU at D=128 on v6e/v7x -- expected.)
            s = lax.dot_general(qh, kh, (((1,), (1,)), ((), ())),
                                preferred_element_type=jnp.float32)  # (tq, tkv)
            m_prev = m_sc[h]
            m_new = jnp.maximum(m_prev, jnp.max(s, axis=-1, keepdims=True))
            alpha = jnp.exp(m_prev - m_new)
            # exp on the compute dtype (bf16 on v6e/v7x) halves EUP pressure;
            # running m / l statistics stay in f32.
            p = jnp.exp((s - m_new).astype(compute_dtype))
            l_sc[h] = alpha * l_sc[h] + jnp.sum(p.astype(jnp.float32),
                                                axis=-1, keepdims=True)
            acc_sc[h] = alpha * acc_sc[h] + lax.dot_general(
                p, vh, (((1,), (0,)), ((), ())),
                preferred_element_type=jnp.float32)
            m_sc[h] = m_new

        run_heads(head_body)

        # --- last kv step: normalize and store (lane-dense output) -----------
        @pl.when(ki == pl.num_programs(2) - 1)
        def _():
            def out_body(h, lo):
                inv_l = pl.reciprocal(l_sc[h], approx=True)
                o_ref[0, :, pl.ds(lo, head_dim)] = (
                    acc_sc[h] * inv_l).astype(o_ref.dtype)

            run_heads(out_body)

    return kernel


def pallas_fused_attention(xqkv, q_gamma, k_gamma, cos_tab, sin_tab,
                           n_heads, head_dim, q_scale, *,
                           tq=512, tkv=512, vmem_limit=48 * 2**20, eps=1e-6):
    B, S, three_hidden = xqkv.shape
    hidden = n_heads * head_dim
    assert three_hidden == 3 * hidden
    assert hidden % 128 == 0, "hidden must be lane aligned (multiple of 128)"
    tq = _fit_tile(S, tq)
    tkv = _fit_tile(S, tkv)
    kernel = _make_fused_attn_kernel(n_heads, head_dim, float(eps),
                                     float(q_scale), xqkv.dtype)

    # q / k / v are sliced out of the fused projection via last-dim block index.
    q_spec = pl.BlockSpec((1, tq, hidden), lambda b, qi, ki: (b, qi, 0))
    k_spec = pl.BlockSpec((1, tkv, hidden), lambda b, qi, ki: (b, ki, 1))
    v_spec = pl.BlockSpec((1, tkv, hidden), lambda b, qi, ki: (b, ki, 2))
    g_spec = pl.BlockSpec((head_dim,), lambda b, qi, ki: (0,))
    cq_spec = pl.BlockSpec((tq, head_dim), lambda b, qi, ki: (qi, 0))
    ck_spec = pl.BlockSpec((tkv, head_dim), lambda b, qi, ki: (ki, 0))

    return pl.pallas_call(
        kernel,
        out_shape=jax.ShapeDtypeStruct((B, S, hidden), xqkv.dtype),
        grid=(B, S // tq, S // tkv),
        in_specs=[q_spec, k_spec, v_spec, g_spec, g_spec,
                  cq_spec, cq_spec, ck_spec, ck_spec],
        out_specs=pl.BlockSpec((1, tq, hidden), lambda b, qi, ki: (b, qi, 0)),
        scratch_shapes=[
            pltpu.VMEM((tq, hidden), xqkv.dtype),              # cached normed/roped/scaled q
            pltpu.VMEM((n_heads, tq, 1), jnp.float32),         # running max
            pltpu.VMEM((n_heads, tq, 1), jnp.float32),         # running sum
            pltpu.VMEM((n_heads, tq, head_dim), jnp.float32),  # output accumulator
        ],
        compiler_params=pltpu.CompilerParams(
            dimension_semantics=("parallel", "parallel", "arbitrary"),
            vmem_limit_bytes=vmem_limit),
    )(xqkv, xqkv, xqkv, q_gamma, k_gamma, cos_tab, sin_tab, cos_tab, sin_tab)


# ----------------------------------------------------------------------------
# SelfAttention forward (Pallas-backed) and a pure-JAX reference.
# ----------------------------------------------------------------------------
def self_attention_pallas(x, params, cos, sin, rope_split, head_dim, cfg=None):
    B, S, hidden = x.shape
    n_heads = hidden // head_dim
    assert n_heads * head_dim == hidden
    assert sum(rope_split) == head_dim
    cfg = dict(cfg) if cfg else _tpu_config()

    # --- parameter prep (once per model in practice; cheap gathers here) -----
    head_perm = _rope_head_perm(rope_split)
    col_perm = jnp.asarray(_wqkv_column_perm(n_heads, head_dim, head_perm))
    wqkv_p = params["wqkv"][:, col_perm]                 # [hidden, 3*hidden]
    q_gamma = params["q_gamma"][head_perm].astype(x.dtype)
    k_gamma = params["k_gamma"][head_perm].astype(x.dtype)
    cos_tab = jnp.concatenate([cos, cos], axis=1).astype(x.dtype)   # [S, D]
    sin_tab = jnp.concatenate([-sin, sin], axis=1).astype(x.dtype)  # sign-folded

    # --- qkv projection (tiled MXU matmul) ------------------------------------
    xqkv = pallas_matmul(x.reshape(B * S, hidden), wqkv_p,
                         vmem_limit=cfg["vmem_limit"])
    xqkv = xqkv.reshape(B, S, 3 * hidden)

    # --- fused norm + rope + flash attention (no q/k HBM round trip) ----------
    # TODO(synk): DistributedAttention's multi-device sequence-parallel path is
    # not modeled; this is the single-chip attention math.
    o = pallas_fused_attention(
        xqkv, q_gamma, k_gamma, cos_tab, sin_tab, n_heads, head_dim,
        q_scale=1.0 / math.sqrt(head_dim),
        tq=cfg["tq"], tkv=cfg["tkv"], vmem_limit=cfg["vmem_limit"])

    # --- output projection -----------------------------------------------------
    out = pallas_matmul(o.reshape(B * S, hidden), params["wo"],
                        vmem_limit=cfg["vmem_limit"])
    return out.reshape(B, S, hidden)


def _rms_norm_ref(x, gamma, eps=1e-6):
    xf = x.astype(jnp.float32)
    n = xf * jax.lax.rsqrt(jnp.mean(xf * xf, axis=-1, keepdims=True) + eps)
    return n.astype(x.dtype) * gamma


def _rope_ref(x, cos, sin, rope_split):
    outs = []
    d_off = 0
    h_off = 0
    for c in rope_split:
        xc = x[..., d_off:d_off + c]
        x1, x2 = xc[..., : c // 2], xc[..., c // 2:]
        ci = cos[:, h_off:h_off + c // 2][None, :, None, :]
        si = sin[:, h_off:h_off + c // 2][None, :, None, :]
        outs.append(jnp.concatenate([x1 * ci - x2 * si, x2 * ci + x1 * si], -1))
        d_off += c
        h_off += c // 2
    return jnp.concatenate(outs, axis=-1)


def self_attention_ref(x, params, cos, sin, rope_split, head_dim):
    B, S, hidden = x.shape
    n_heads = hidden // head_dim
    xqkv = (x.reshape(B * S, hidden) @ params["wqkv"]).reshape(
        B, S, n_heads, 3 * head_dim)
    q, k, v = jnp.split(xqkv, 3, axis=-1)
    q = _rope_ref(_rms_norm_ref(q, params["q_gamma"]), cos, sin, rope_split)
    k = _rope_ref(_rms_norm_ref(k, params["k_gamma"]), cos, sin, rope_split)
    scale = 1.0 / math.sqrt(head_dim)
    s = jnp.einsum("bqhd,bkhd->bhqk", q, k) * scale
    p = jax.nn.softmax(s, axis=-1)
    o = jnp.einsum("bhqk,bkhd->bqhd", p, v).reshape(B, S, hidden)
    return (o.reshape(B * S, hidden) @ params["wo"]).reshape(B, S, hidden)


if __name__ == "__main__":
    # Small shapes consistent with the module defaults:
    #   head_dim=128 with rope_split=(64,32,32) (StepVideo default),
    #   hidden_dim=256 -> n_heads=2, B=2, rope_positions (F,Ht,W)=(2,2,2) -> S=8.
    B, S = 2, 8
    hidden_dim, head_dim = 256, 128
    rope_split = (64, 32, 32)
    assert sum(rope_split) == head_dim

    key = jax.random.PRNGKey(0)
    kx, kw1, kw2, kg1, kg2, kth = jax.random.split(key, 6)

    x = jax.random.normal(kx, (B, S, hidden_dim), dtype=jnp.float32)
    params = {
        "wqkv": 0.02 * jax.random.normal(kw1, (hidden_dim, 3 * hidden_dim),
                                         dtype=jnp.float32),
        "wo": 0.02 * jax.random.normal(kw2, (hidden_dim, hidden_dim),
                                       dtype=jnp.float32),
        "q_gamma": 1.0 + 0.1 * jax.random.normal(kg1, (head_dim,),
                                                 dtype=jnp.float32),
        "k_gamma": 1.0 + 0.1 * jax.random.normal(kg2, (head_dim,),
                                                 dtype=jnp.float32),
    }
    # Synthetic (deterministic) rotary tables: cos/sin of shape [S, head_dim/2]
    theta = jax.random.uniform(kth, (S, head_dim // 2), dtype=jnp.float32,
                               minval=0.0, maxval=2.0 * math.pi)
    cos, sin = jnp.cos(theta), jnp.sin(theta)

    out = self_attention_pallas(x, params, cos, sin, rope_split, head_dim)
    out = jax.block_until_ready(out)

    ref = self_attention_ref(x, params, cos, sin, rope_split, head_dim)
    # Tolerance accounts for the EUP approx reciprocal in the flash finalize.
    np.testing.assert_allclose(np.asarray(out), np.asarray(ref),
                               rtol=2e-3, atol=2e-3)

    print("KERNEL_OK")
</pallas_src>

<mosaic_0001>
module attributes {stable_mosaic.version = 11 : i64} {
  func.func @_matmul_kernel(%arg0: i32, %arg1: i32, %arg2: i32, %arg3: memref<16x256xf32, #tpu.memory_space<vmem>>, %arg4: memref<256x768xf32, #tpu.memory_space<vmem>>, %arg5: memref<16x768xf32, #tpu.memory_space<vmem>>, %arg6: memref<16x768xf32, #tpu.memory_space<vmem>>) attributes {dimension_semantics = [#tpu.dimension_semantics<parallel>, #tpu.dimension_semantics<parallel>, #tpu.dimension_semantics<arbitrary>], iteration_bounds = array<i64: 1, 1, 1>, scalar_prefetch = 0 : i64, scratch_operands = 1 : i64, tpu.core_type = #tpu.core_type<tc>, window_params = [{transform_indices = @transform_0, window_bounds = array<i64: 16, 256>}, {transform_indices = @transform_1, window_bounds = array<i64: 256, 768>}, {transform_indices = @transform_2, window_bounds = array<i64: 16, 768>}]} {
    %c0_i32 = arith.constant 0 : i32
    %0 = arith.cmpi eq, %arg2, %c0_i32 : i32
    %1 = arith.extui %0 : i1 to i32
    %c0_i32_0 = arith.constant 0 : i32
    %2 = arith.cmpi ne, %1, %c0_i32_0 : i32
    scf.if %2 {
      %cst_10 = arith.constant 0.000000e+00 : f32
      %12 = vector.broadcast %cst_10 : f32 to vector<16x768xf32>
      %c0_11 = arith.constant 0 : index
      %c0_12 = arith.constant 0 : index
      %13 = vector.load %arg6[%c0_11, %c0_12] : memref<16x768xf32, #tpu.memory_space<vmem>>, vector<16x768xf32>
      tpu.vector_store %arg6[%c0_11, %c0_12], %12 {strides = array<i32>} : memref<16x768xf32, #tpu.memory_space<vmem>>, vector<16x768xf32>,
    } else {
    }
    %c0 = arith.constant 0 : index
    %c0_1 = arith.constant 0 : index
    %3 = vector.load %arg6[%c0, %c0_1] : memref<16x768xf32, #tpu.memory_space<vmem>>, vector<16x768xf32>
    %c0_2 = arith.constant 0 : index
    %c0_3 = arith.constant 0 : index
    %4 = vector.load %arg3[%c0_2, %c0_3] : memref<16x256xf32, #tpu.memory_space<vmem>>, vector<16x256xf32>
    %c0_4 = arith.constant 0 : index
    %c0_5 = arith.constant 0 : index
    %5 = vector.load %arg4[%c0_4, %c0_5] : memref<256x768xf32, #tpu.memory_space<vmem>>, vector<256x768xf32>
    %cst = arith.constant dense<0.000000e+00> : vector<16x768xf32>
    %6 = tpu.matmul %4, %5, %cst {dimension_numbers = #tpu.dot_dimension_numbers<[1], [0], [0], [1], [0, 0, 1, 1], [], []>} : vector<16x256xf32>, vector<256x768xf32>, vector<16x768xf32> -> vector<16x768xf32>
    %7 = arith.addf %3, %6 : vector<16x768xf32>
    %c0_6 = arith.constant 0 : index
    %c0_7 = arith.constant 0 : index
    %8 = vector.load %arg6[%c0_6, %c0_7] : memref<16x768xf32, #tpu.memory_space<vmem>>, vector<16x768xf32>
    tpu.vector_store %arg6[%c0_6, %c0_7], %7 {strides = array<i32>} : memref<16x768xf32, #tpu.memory_space<vmem>>, vector<16x768xf32>,
    %c0_i32_8 = arith.constant 0 : i32
    %9 = arith.cmpi eq, %arg2, %c0_i32_8 : i32
    %10 = arith.extui %9 : i1 to i32
    %c0_i32_9 = arith.constant 0 : i32
    %11 = arith.cmpi ne, %10, %c0_i32_9 : i32
    scf.if %11 {
      %c0_10 = arith.constant 0 : index
      %c0_11 = arith.constant 0 : index
      %12 = vector.load %arg6[%c0_10, %c0_11] : memref<16x768xf32, #tpu.memory_space<vmem>>, vector<16x768xf32>
      %c0_12 = arith.constant 0 : index
      %c0_13 = arith.constant 0 : index
      %13 = vector.load %arg5[%c0_12, %c0_13] : memref<16x768xf32, #tpu.memory_space<vmem>>, vector<16x768xf32>
      tpu.vector_store %arg5[%c0_12, %c0_13], %12 {strides = array<i32>} : memref<16x768xf32, #tpu.memory_space<vmem>>, vector<16x768xf32>,
    } else {
    }
    return
  }
  func.func @transform_0(%arg0: i32, %arg1: i32, %arg2: i32) -> (i32, i32) {
    %c0_i32 = arith.constant 0 : i32
    return %arg0, %arg2 : i32, i32
  }
  func.func @transform_1(%arg0: i32, %arg1: i32, %arg2: i32) -> (i32, i32) {
    %c0_i32 = arith.constant 0 : i32
    return %arg2, %arg1 : i32, i32
  }
  func.func @transform_2(%arg0: i32, %arg1: i32, %arg2: i32) -> (i32, i32) {
    %c0_i32 = arith.constant 0 : i32
    return %arg0, %arg1 : i32, i32
  }
}

</mosaic_0001>

<bundles_post_ra>
// kernel: tpu_custom_call.1
= control target key start
LH: loop header
LB: loop body
LE: loop exit
PB: predicated region body
PF: predicated region fallthrough
CT: control target
= control target key end

     0   :  { %7 = vsyncpa [#allocation4], 0  ;;  %s946_s0 = inlined_call_operand.hbm [shape: f32[16,256], index: 0, kind: input, shape index: {}]   ;;  %s947_s1 = inlined_call_operand.hbm [shape: f32[256,768], index: 1, kind: input, shape index: {}]   ;;  %s948_s2 = inlined_call_operand.hbm [shape: f32[16,768], index: 2, kind: output, shape index: {}]  }
   0x1   :  { %8 = vsyncpa [#allocation7], 0 }
   0x2   :  { %9 = vsyncpa [#allocation5], 0  ;;  %s867_s9 = smov [#allocation3]   ;;  %s795_s13 = scalar_lea.hbm %s946_s0, 512 }
   0x3   :  { %s15_s10 = sshll.u32 %s867_s9, 4  ;;  %p796_p0 = scmp.ne.s32.totalorder %s946_s0, %s795_s13  ;;  %s16_s10 = int_to_ptr.vmem [resolvable:$true] %s15_s10 }
   0x4   :  { %p799_p1 = scmp.lt.u32.totalorder %s795_s13, %s946_s0 }
   0x6   :  { %p801_p2 = pnand %p799_p1, %p796_p0 }
   0x8   :  { %804 = shalt.err (!%p801_p2)
}
   0x9   :  { %s805_s18 = scalar_lea.vmem %s16_s10, 512  ;;  %p810_p4 = scmp.lt.s32.totalorder %s16_s10, %s16_s10 }
   0xa   :  { %p806_p3 = scmp.ne.s32.totalorder %s16_s10, %s805_s18  ;;  %p811_p5 = scmp.lt.s32.totalorder %s805_s18, %s805_s18 }
   0xc   :  { %p812_p6 = por %p811_p5, %p810_p4 }
   0xe   :  { %p813_p7 = pnand %p812_p6, %p806_p3 }
  0x10   :  { %816 = shalt.err (!%p813_p7)
}
  0x11   :  { %s868_s19 = smov 256   ;;  %s869_s20 = smov 16  }
  0x12   :  { %21 = dma.hbm_to_vmem [thread:$0]  %s946_s0, 512, %s16_s10, [#allocation4], %s868_s19, %s868_s19, %s869_s20  }
  0x13   :  { %s870_s23 = smov [#allocation6]   ;;  %s817_s27 = scalar_lea.hbm %s947_s1, 24576 }
  0x14   :  { %s27_s24 = sshll.u32 %s870_s23, 4  ;;  %p818_p8 = scmp.ne.s32.totalorder %s947_s1, %s817_s27  ;;  %s28_s24 = int_to_ptr.vmem [resolvable:$true] %s27_s24 }
  0x15   :  { %p821_p9 = scmp.lt.u32.totalorder %s817_s27, %s947_s1 }
  0x17   :  { %p823_p10 = pnand %p821_p9, %p818_p8 }
  0x19   :  { %826 = shalt.err (!%p823_p10)
}
  0x1a   :  { %s827_s4 = scalar_lea.vmem %s28_s24, 24576  ;;  %p832_p12 = scmp.lt.s32.totalorder %s28_s24, %s28_s24 }
  0x1b   :  { %p828_p11 = scmp.ne.s32.totalorder %s28_s24, %s827_s4  ;;  %p833_p13 = scmp.lt.s32.totalorder %s827_s4, %s827_s4 }
  0x1d   :  { %p834_p0 = por %p833_p13, %p832_p12 }
  0x1f   :  { %p835_p1 = pnand %p834_p0, %p828_p11 }
  0x21   :  { %838 = shalt.err (!%p835_p1)
}
  0x22   :  { %s871_s0 = smov 768   ;;  %s872_s5 = smov 48  }
  0x23   :  { %33 = dma.hbm_to_vmem [thread:$0]  %s947_s1, 24576, %s28_s24, [#allocation7], %s871_s0, %s871_s0, %s872_s5  }
  0x24   :  { %861 = dma.done.wait [#allocation4], 512  }
  0x25   :  { %862 = vsyncadd [#allocation4], 4294966784 }
  0x26   :  { %863 = dma.done.wait [#allocation7], 24576  }
  0x27   :  { %864 = vsyncadd [#allocation7], 4294942720  ;;  %v73_v0 = vld [vmem:[#allocation6 + $0x8] sm:$0xff]  ;;  %v79_v1 = vld [vmem:[#allocation6 + $0x38] sm:$0xff]  ;;  %s873_s1 = smov [#allocation8]  }
  0x28   :  { %v75_v2 = vld [vmem:[#allocation6 + $0x18] sm:$0xff]  ;;  %v564_v3 = vpack.c.bf16 %v79_v1, %v73_v0  ;;  %v81_v4 = vld [vmem:[#allocation6 + $0x48] sm:$0xff]  ;;  %v72_v5 = vld [vmem:[#allocation6] sm:$0xff]  ;;  %s551_s8 = sshll.u32 %s873_s1, 4  ;;  %s552_s8 = int_to_ptr.vmem [resolvable:$true] %s551_s8 }
  0x29   :  { %v78_v6 = vld [vmem:[#allocation6 + $0x30] sm:$0xff]  ;;  %v628_v7 = vpack.c.bf16 %v81_v4, %v75_v2  ;;  %v80_v10 = vld [vmem:[#allocation6 + $0x40] sm:$0xff]  ;;  %v85_v11 = vld [vmem:[#allocation6 + $0x68] sm:$0xff]  ;;  %s839_s9 = scalar_lea.vmem %s552_s8, 1536  ;;  %p844_p3 = scmp.lt.s32.totalorder %s552_s8, %s552_s8 }
  0x2a   :  { %v566_v8 = vpack.c.bf16 %v78_v6, %v72_v5  ;;  %v74_v9 = vld [vmem:[#allocation6 + $0x10] sm:$0xff]  ;;  %565 = vmatprep.subr.bf16.mxu0 %v564_v3  ;;  %v91_v13 = vld [vmem:[#allocation6 + $0x98] sm:$0xff]  ;;  %v93_v15 = vld [vmem:[#allocation6 + $0xa8] sm:$0xff]  ;;  %p840_p2 = scmp.ne.s32.totalorder %s552_s8, %s839_s9  ;;  %p845_p4 = scmp.lt.s32.totalorder %s839_s9, %s839_s9 }
  0x2b   :  { %v630_v12 = vpack.c.bf16 %v80_v10, %v74_v9  ;;  %v87_v14 = vld [vmem:[#allocation6 + $0x78] sm:$0xff]  ;;  %629 = vmatprep.subr.bf16.mxu1 %v628_v7  ;;  %v568_v16 = vpack.c.bf16 %v91_v13, %v85_v11  ;;  %v84_v18 = vld [vmem:[#allocation6 + $0x60] sm:$0xff]  ;;  %v90_v19 = vld [vmem:[#allocation6 + $0x90] sm:$0xff] }
  0x2c   :  { %567 = vmatpush1.bf16.msra.mxu0 %v566_v8  ;;  %v632_v17 = vpack.c.bf16 %v93_v15, %v87_v14  ;;  %v86_v20 = vld [vmem:[#allocation6 + $0x70] sm:$0xff]  ;;  %v570_v21 = vpack.c.bf16 %v90_v19, %v84_v18  ;;  %v92_v22 = vld [vmem:[#allocation6 + $0xa0] sm:$0xff]  ;;  %v97_v23 = vld [vmem:[#allocation6 + $0xc8] sm:$0xff]  ;;  %p846_p5 = por %p845_p4, %p844_p3 }
  0x2d   :  { %631 = vmatpush1.bf16.msra.mxu1 %v630_v12  ;;  %v103_v24 = vld [vmem:[#allocation6 + $0xf8] sm:$0xff]  ;;  %569 = vmatprep.subr.bf16.mxu0 %v568_v16  ;;  %v634_v25 = vpack.c.bf16 %v92_v22, %v86_v20  ;;  %v105_v28 = vld [vmem:[#allocation6 + $0x108] sm:$0xff]  ;;  %v96_v29 = vld [vmem:[#allocation6 + $0xc0] sm:$0xff] }
  0x2e   :  { %633 = vmatprep.subr.bf16.mxu1 %v632_v17  ;;  %v572_v26 = vpack.c.bf16 %v103_v24, %v97_v23  ;;  %v99_v27 = vld [vmem:[#allocation6 + $0xd8] sm:$0xff]  ;;  %v102_v31 = vld [vmem:[#allocation6 + $0xf0] sm:$0xff]  ;;  %v104_v33 = vld [vmem:[#allocation6 + $0x100] sm:$0xff]  ;;  %p847_p6 = pnand %p846_p5, %p840_p2 }
  0x2f   :  { %v636_v30 = vpack.c.bf16 %v105_v28, %v99_v27  ;;  %v98_v32 = vld [vmem:[#allocation6 + $0xd0] sm:$0xff]  ;;  %v574_v34 = vpack.c.bf16 %v102_v31, %v96_v29  ;;  %v109_v35 = vld [vmem:[#allocation6 + $0x128] sm:$0xff]  ;;  %v115_v36 = vld [vmem:[#allocation6 + $0x158] sm:$0xff] }
  0x30   :  { %571 = vmatpush1.bf16.msra.mxu0 %v570_v21  ;;  %v111_v37 = vld [vmem:[#allocation6 + $0x138] sm:$0xff]  ;;  %v638_v38 = vpack.c.bf16 %v104_v33, %v98_v32  ;;  %v576_v39 = vpack.c.bf16 %v115_v36, %v109_v35  ;;  %v117_v40 = vld [vmem:[#allocation6 + $0x168] sm:$0xff]  ;;  %v108_v41 = vld [vmem:[#allocation6 + $0x120] sm:$0xff] }
  0x31   :  { %635 = vmatpush1.bf16.msra.mxu1 %v634_v25  ;;  %573 = vmatprep.subr.bf16.mxu0 %v572_v26  ;;  %v114_v42 = vld [vmem:[#allocation6 + $0x150] sm:$0xff]  ;;  %v640_v43 = vpack.c.bf16 %v117_v40, %v111_v37  ;;  %v116_v45 = vld [vmem:[#allocation6 + $0x160] sm:$0xff]  ;;  %v121_v46 = vld [vmem:[#allocation6 + $0x188] sm:$0xff] }
  0x32   :  { %637 = vmatprep.subr.bf16.mxu1 %v636_v30  ;;  %v110_v44 = vld [vmem:[#allocation6 + $0x130] sm:$0xff]  ;;  %v127_v47 = vld [vmem:[#allocation6 + $0x1b8] sm:$0xff]  ;;  %v129_v49 = vld [vmem:[#allocation6 + $0x1c8] sm:$0xff]  ;;  %v578_v50 = vpack.c.bf16 %v114_v42, %v108_v41 }
  0x33   :  { %v123_v48 = vld [vmem:[#allocation6 + $0x198] sm:$0xff]  ;;  %v642_v51 = vpack.c.bf16 %v116_v45, %v110_v44  ;;  %v580_v52 = vpack.c.bf16 %v127_v47, %v121_v46  ;;  %v120_v53 = vld [vmem:[#allocation6 + $0x180] sm:$0xff]  ;;  %v126_v54 = vld [vmem:[#allocation6 + $0x1b0] sm:$0xff] }
  0x34   :  { %575 = vmatpush1.bf16.msra.mxu0 %v574_v34  ;;  %v122_v55 = vld [vmem:[#allocation6 + $0x190] sm:$0xff]  ;;  %v644_v56 = vpack.c.bf16 %v129_v49, %v123_v48  ;;  %v128_v57 = vld [vmem:[#allocation6 + $0x1c0] sm:$0xff]  ;;  %v133_v58 = vld [vmem:[#allocation6 + $0x1e8] sm:$0xff]  ;;  %v582_v62 = vpack.c.bf16 %v126_v54, %v120_v53 }
  0x35   :  { %639 = vmatpush1.bf16.msra.mxu1 %v638_v38  ;;  %577 = vmatprep.subr.bf16.mxu0 %v576_v39  ;;  %v139_v59 = vld [vmem:[#allocation6 + $0x218] sm:$0xff]  ;;  %v141_v61 = vld [vmem:[#allocation6 + $0x228] sm:$0xff]  ;;  %v646_v63 = vpack.c.bf16 %v128_v57, %v122_v55  ;;  %v132_v1 = vld [vmem:[#allocation6 + $0x1e0] sm:$0xff] }
  0x36   :  { %641 = vmatprep.subr.bf16.mxu1 %v640_v43  ;;  %v135_v60 = vld [vmem:[#allocation6 + $0x1f8] sm:$0xff]  ;;  %v584_v0 = vpack.c.bf16 %v139_v59, %v133_v58  ;;  %v138_v2 = vld [vmem:[#allocation6 + $0x210] sm:$0xff]  ;;  %v140_v5 = vld [vmem:[#allocation6 + $0x220] sm:$0xff] }
  0x37   :  { %v134_v3 = vld [vmem:[#allocation6 + $0x1f0] sm:$0xff]  ;;  %v648_v4 = vpack.c.bf16 %v141_v61, %v135_v60  ;;  %v145_v6 = vld [vmem:[#allocation6 + $0x248] sm:$0xff]  ;;  %v151_v7 = vld [vmem:[#allocation6 + $0x278] sm:$0xff]  ;;  %v586_v10 = vpack.c.bf16 %v138_v2, %v132_v1 }
  0x38   :  { %579 = vmatpush1.bf16.msra.mxu0 %v578_v50  ;;  %v147_v8 = vld [vmem:[#allocation6 + $0x258] sm:$0xff]  ;;  %v153_v9 = vld [vmem:[#allocation6 + $0x288] sm:$0xff]  ;;  %v650_v11 = vpack.c.bf16 %v140_v5, %v134_v3  ;;  %v588_v12 = vpack.c.bf16 %v151_v7, %v145_v6  ;;  %v144_v13 = vld [vmem:[#allocation6 + $0x240] sm:$0xff] }
  0x39   :  { %643 = vmatpush1.bf16.msra.mxu1 %v642_v51  ;;  %581 = vmatprep.subr.bf16.mxu0 %v580_v52  ;;  %v150_v14 = vld [vmem:[#allocation6 + $0x270] sm:$0xff]  ;;  %v652_v16 = vpack.c.bf16 %v153_v9, %v147_v8  ;;  %v152_v17 = vld [vmem:[#allocation6 + $0x280] sm:$0xff]  ;;  %v157_v18 = vld [vmem:[#allocation6 + $0x2a8] sm:$0xff] }
  0x3a   :  { %645 = vmatprep.subr.bf16.mxu1 %v644_v56  ;;  %v146_v15 = vld [vmem:[#allocation6 + $0x250] sm:$0xff]  ;;  %v163_v19 = vld [vmem:[#allocation6 + $0x2d8] sm:$0xff]  ;;  %v165_v21 = vld [vmem:[#allocation6 + $0x2e8] sm:$0xff]  ;;  %v590_v22 = vpack.c.bf16 %v150_v14, %v144_v13 }
  0x3b   :  { %v159_v20 = vld [vmem:[#allocation6 + $0x2b8] sm:$0xff]  ;;  %v654_v23 = vpack.c.bf16 %v152_v17, %v146_v15  ;;  %v592_v24 = vpack.c.bf16 %v163_v19, %v157_v18  ;;  %v156_v25 = vld [vmem:[#allocation6 + $0x2a0] sm:$0xff]  ;;  %v162_v26 = vld [vmem:[#allocation6 + $0x2d0] sm:$0xff] }
  0x3c   :  { %583 = vmatpush1.bf16.msra.mxu0 %v582_v62  ;;  %v158_v27 = vld [vmem:[#allocation6 + $0x2b0] sm:$0xff]  ;;  %v656_v28 = vpack.c.bf16 %v165_v21, %v159_v20  ;;  %v164_v29 = vld [vmem:[#allocation6 + $0x2e0] sm:$0xff]  ;;  %v169_v30 = vld [vmem:[#allocation6 + $0x308] sm:$0xff]  ;;  %v594_v34 = vpack.c.bf16 %v162_v26, %v156_v25 }
  0x3d   :  { %647 = vmatpush1.bf16.msra.mxu1 %v646_v63  ;;  %585 = vmatprep.subr.bf16.mxu0 %v584_v0  ;;  %v175_v31 = vld [vmem:[#allocation6 + $0x338] sm:$0xff]  ;;  %v177_v33 = vld [vmem:[#allocation6 + $0x348] sm:$0xff]  ;;  %v658_v35 = vpack.c.bf16 %v164_v29, %v158_v27  ;;  %v168_v37 = vld [vmem:[#allocation6 + $0x300] sm:$0xff] }
  0x3e   :  { %649 = vmatprep.subr.bf16.mxu1 %v648_v4  ;;  %v171_v32 = vld [vmem:[#allocation6 + $0x318] sm:$0xff]  ;;  %v596_v36 = vpack.c.bf16 %v175_v31, %v169_v30  ;;  %v174_v38 = vld [vmem:[#allocation6 + $0x330] sm:$0xff]  ;;  %v176_v41 = vld [vmem:[#allocation6 + $0x340] sm:$0xff] }
  0x3f   :  { %v170_v39 = vld [vmem:[#allocation6 + $0x310] sm:$0xff]  ;;  %v660_v40 = vpack.c.bf16 %v177_v33, %v171_v32  ;;  %v181_v42 = vld [vmem:[#allocation6 + $0x368] sm:$0xff]  ;;  %v187_v43 = vld [vmem:[#allocation6 + $0x398] sm:$0xff]  ;;  %v598_v46 = vpack.c.bf16 %v174_v38, %v168_v37 }
  0x40   :  { %587 = vmatpush1.bf16.msra.mxu0 %v586_v10  ;;  %v183_v44 = vld [vmem:[#allocation6 + $0x378] sm:$0xff]  ;;  %v189_v45 = vld [vmem:[#allocation6 + $0x3a8] sm:$0xff]  ;;  %v662_v47 = vpack.c.bf16 %v176_v41, %v170_v39  ;;  %v600_v48 = vpack.c.bf16 %v187_v43, %v181_v42  ;;  %v180_v49 = vld [vmem:[#allocation6 + $0x360] sm:$0xff] }
  0x41   :  { %651 = vmatpush1.bf16.msra.mxu1 %v650_v11  ;;  %589 = vmatprep.subr.bf16.mxu0 %v588_v12  ;;  %v186_v50 = vld [vmem:[#allocation6 + $0x390] sm:$0xff]  ;;  %v664_v52 = vpack.c.bf16 %v189_v45, %v183_v44  ;;  %v188_v53 = vld [vmem:[#allocation6 + $0x3a0] sm:$0xff]  ;;  %v193_v54 = vld [vmem:[#allocation6 + $0x3c8] sm:$0xff] }
  0x42   :  { %653 = vmatprep.subr.bf16.mxu1 %v652_v16  ;;  %v182_v51 = vld [vmem:[#allocation6 + $0x370] sm:$0xff]  ;;  %v199_v55 = vld [vmem:[#allocation6 + $0x3f8] sm:$0xff]  ;;  %v201_v57 = vld [vmem:[#allocation6 + $0x408] sm:$0xff]  ;;  %v602_v58 = vpack.c.bf16 %v186_v50, %v180_v49 }
  0x43   :  { %v195_v56 = vld [vmem:[#allocation6 + $0x3d8] sm:$0xff]  ;;  %v666_v59 = vpack.c.bf16 %v188_v53, %v182_v51  ;;  %v604_v60 = vpack.c.bf16 %v199_v55, %v193_v54  ;;  %v192_v61 = vld [vmem:[#allocation6 + $0x3c0] sm:$0xff]  ;;  %v198_v62 = vld [vmem:[#allocation6 + $0x3f0] sm:$0xff] }
  0x44   :  { %591 = vmatpush1.bf16.msra.mxu0 %v590_v22  ;;  %v194_v63 = vld [vmem:[#allocation6 + $0x3d0] sm:$0xff]  ;;  %v668_v0 = vpack.c.bf16 %v201_v57, %v195_v56  ;;  %v200_v1 = vld [vmem:[#allocation6 + $0x400] sm:$0xff]  ;;  %v205_v2 = vld [vmem:[#allocation6 + $0x428] sm:$0xff]  ;;  %v606_v6 = vpack.c.bf16 %v198_v62, %v192_v61 }
  0x45   :  { %655 = vmatpush1.bf16.msra.mxu1 %v654_v23  ;;  %593 = vmatprep.subr.bf16.mxu0 %v592_v24  ;;  %v211_v3 = vld [vmem:[#allocation6 + $0x458] sm:$0xff]  ;;  %v213_v5 = vld [vmem:[#allocation6 + $0x468] sm:$0xff]  ;;  %v204_v7 = vld [vmem:[#allocation6 + $0x420] sm:$0xff]  ;;  %v670_v8 = vpack.c.bf16 %v200_v1, %v194_v63 }
  0x46   :  { %657 = vmatprep.subr.bf16.mxu1 %v656_v28  ;;  %v207_v4 = vld [vmem:[#allocation6 + $0x438] sm:$0xff]  ;;  %v608_v9 = vpack.c.bf16 %v211_v3, %v205_v2  ;;  %v210_v10 = vld [vmem:[#allocation6 + $0x450] sm:$0xff]  ;;  %v212_v12 = vld [vmem:[#allocation6 + $0x460] sm:$0xff] }
  0x47   :  { %v206_v11 = vld [vmem:[#allocation6 + $0x430] sm:$0xff]  ;;  %v672_v13 = vpack.c.bf16 %v213_v5, %v207_v4  ;;  %v217_v14 = vld [vmem:[#allocation6 + $0x488] sm:$0xff]  ;;  %v223_v15 = vld [vmem:[#allocation6 + $0x4b8] sm:$0xff]  ;;  %v610_v19 = vpack.c.bf16 %v210_v10, %v204_v7 }
  0x48   :  { %595 = vmatpush1.bf16.msra.mxu0 %v594_v34  ;;  %v916_v16 = vld [vmem:[#allocation3 + $0x8] sm:$0xff]  ;;  %v219_v17 = vld [vmem:[#allocation6 + $0x498] sm:$0xff]  ;;  %v674_v20 = vpack.c.bf16 %v212_v12, %v206_v11  ;;  %v612_v21 = vpack.c.bf16 %v223_v15, %v217_v14  ;;  %v216_v22 = vld [vmem:[#allocation6 + $0x480] sm:$0xff] }
  0x49   :  { %659 = vmatpush1.bf16.msra.mxu1 %v658_v35  ;;  %597 = vmatprep.subr.bf16.mxu0 %v596_v36  ;;  %v225_v18 = vld [vmem:[#allocation6 + $0x4c8] sm:$0xff]  ;;  %v222_v23 = vld [vmem:[#allocation6 + $0x4b0] sm:$0xff]  ;;  %v224_v26 = vld [vmem:[#allocation6 + $0x4c0] sm:$0xff] }
  0x4a   :  { %661 = vmatprep.subr.bf16.mxu1 %v660_v40  ;;  %328 = vmatprep.mubr.f32.mxu0 %v916_v16  ;;  %v218_v24 = vld [vmem:[#allocation6 + $0x490] sm:$0xff]  ;;  %v676_v25 = vpack.c.bf16 %v225_v18, %v219_v17  ;;  %v229_v27 = vld [vmem:[#allocation6 + $0x4e8] sm:$0xff]  ;;  %v235_v28 = vld [vmem:[#allocation6 + $0x518] sm:$0xff]  ;;  %v614_v31 = vpack.c.bf16 %v222_v23, %v216_v22 }
  0x4b   :  { %405 = vmatprep.mubr.f32.mxu1 %v916_v16  ;;  %v231_v29 = vld [vmem:[#allocation6 + $0x4f8] sm:$0xff]  ;;  %v237_v30 = vld [vmem:[#allocation6 + $0x528] sm:$0xff]  ;;  %v678_v32 = vpack.c.bf16 %v224_v26, %v218_v24  ;;  %v616_v33 = vpack.c.bf16 %v235_v28, %v229_v27  ;;  %v228_v34 = vld [vmem:[#allocation6 + $0x4e0] sm:$0xff] }
  0x4c   :  { %599 = vmatpush1.bf16.msra.mxu0 %v598_v46  ;;  %v234_v35 = vld [vmem:[#allocation6 + $0x510] sm:$0xff]  ;;  %v680_v37 = vpack.c.bf16 %v237_v30, %v231_v29  ;;  %v236_v38 = vld [vmem:[#allocation6 + $0x520] sm:$0xff]  ;;  %v241_v39 = vld [vmem:[#allocation6 + $0x548] sm:$0xff] }
  0x4d   :  { %663 = vmatpush1.bf16.msra.mxu1 %v662_v47  ;;  %601 = vmatprep.subr.bf16.mxu0 %v600_v48  ;;  %v230_v36 = vld [vmem:[#allocation6 + $0x4f0] sm:$0xff]  ;;  %v247_v40 = vld [vmem:[#allocation6 + $0x578] sm:$0xff]  ;;  %v249_v42 = vld [vmem:[#allocation6 + $0x588] sm:$0xff]  ;;  %v618_v43 = vpack.c.bf16 %v234_v35, %v228_v34 }
  0x4e   :  { %665 = vmatprep.subr.bf16.mxu1 %v664_v52  ;;  %v243_v41 = vld [vmem:[#allocation6 + $0x558] sm:$0xff]  ;;  %v682_v44 = vpack.c.bf16 %v236_v38, %v230_v36  ;;  %v620_v45 = vpack.c.bf16 %v247_v40, %v241_v39  ;;  %v240_v46 = vld [vmem:[#allocation6 + $0x540] sm:$0xff]  ;;  %v246_v47 = vld [vmem:[#allocation6 + $0x570] sm:$0xff] }
  0x4f   :  { %v242_v48 = vld [vmem:[#allocation6 + $0x550] sm:$0xff]  ;;  %v684_v49 = vpack.c.bf16 %v249_v42, %v243_v41  ;;  %v248_v50 = vld [vmem:[#allocation6 + $0x580] sm:$0xff]  ;;  %v253_v51 = vld [vmem:[#allocation6 + $0x5a8] sm:$0xff]  ;;  %v622_v55 = vpack.c.bf16 %v246_v47, %v240_v46 }
  0x50   :  { %603 = vmatpush1.bf16.msra.mxu0 %v602_v58  ;;  %v259_v52 = vld [vmem:[#allocation6 + $0x5d8] sm:$0xff]  ;;  %v261_v54 = vld [vmem:[#allocation6 + $0x5e8] sm:$0xff]  ;;  %v686_v56 = vpack.c.bf16 %v248_v50, %v242_v48  ;;  %v252_v58 = vld [vmem:[#allocation6 + $0x5a0] sm:$0xff] }
  0x51   :  { %667 = vmatpush1.bf16.msra.mxu1 %v666_v59  ;;  %605 = vmatprep.subr.bf16.mxu0 %v604_v60  ;;  %v255_v53 = vld [vmem:[#allocation6 + $0x5b8] sm:$0xff]  ;;  %v624_v57 = vpack.c.bf16 %v259_v52, %v253_v51  ;;  %v258_v59 = vld [vmem:[#allocation6 + $0x5d0] sm:$0xff]  ;;  %v260_v62 = vld [vmem:[#allocation6 + $0x5e0] sm:$0xff] }
  0x52   :  { %669 = vmatprep.subr.bf16.mxu1 %v668_v0  ;;  %v254_v60 = vld [vmem:[#allocation6 + $0x5b0] sm:$0xff]  ;;  %v688_v61 = vpack.c.bf16 %v261_v54, %v255_v53  ;;  %v77_v63 = vld [vmem:[#allocation6 + $0x28] sm:$0xff]  ;;  %v83_v0 = vld [vmem:[#allocation6 + $0x58] sm:$0xff]  ;;  %v626_v1 = vpack.c.bf16 %v258_v59, %v252_v58 }
  0x53   :  { %v690_v2 = vpack.c.bf16 %v260_v62, %v254_v60  ;;  %v692_v3 = vpack.c.bf16 %v83_v0, %v77_v63  ;;  %v76_v4 = vld [vmem:[#allocation6 + $0x20] sm:$0xff]  ;;  %v82_v5 = vld [vmem:[#allocation6 + $0x50] sm:$0xff]  ;;  %v95_v7 = vld [vmem:[#allocation6 + $0xb8] sm:$0xff] }
  0x54   :  { %607 = vmatpush1.bf16.msra.mxu0 %v606_v6  ;;  %v89_v6 = vld [vmem:[#allocation6 + $0x88] sm:$0xff]  ;;  %v88_v11 = vld [vmem:[#allocation6 + $0x80] sm:$0xff]  ;;  %v94_v12 = vld [vmem:[#allocation6 + $0xb0] sm:$0xff] }
  0x55   :  { %671 = vmatpush1.bf16.msra.mxu1 %v670_v8  ;;  %609 = vmatprep.subr.bf16.mxu0 %v608_v9  ;;  %v920_v8 = vld [vmem:[#allocation3] sm:$0xff]  ;;  %v694_v9 = vpack.c.bf16 %v82_v5, %v76_v4  ;;  %v696_v10 = vpack.c.bf16 %v95_v7, %v89_v6  ;;  %v107_v14 = vld [vmem:[#allocation6 + $0x118] sm:$0xff]  ;;  %v698_v17 = vpack.c.bf16 %v94_v12, %v88_v11  ;;  %v924_v18 = vld [vmem:[#allocation3 + $0x10] sm:$0xff] }
  0x56   :  { %673 = vmatprep.subr.bf16.mxu1 %v672_v13  ;;  %v101_v13 = vld [vmem:[#allocation6 + $0xe8] sm:$0xff]  ;;  %v71_v15 = vld [vmem:[#allocation3 + $0x18] sm:$0xff]  ;;  %v112_v26 = vld [vmem:[#allocation6 + $0x140] sm:$0xff] }
  0x57   :  { %v113_v22 = vld [vmem:[#allocation6 + $0x148] sm:$0xff]  ;;  %v119_v23 = vld [vmem:[#allocation6 + $0x178] sm:$0xff]  ;;  %v118_v27 = vld [vmem:[#allocation6 + $0x170] sm:$0xff] }
  0x58   :  { %611 = vmatpush1.bf16.msra.mxu0 %v610_v19  ;;  %v700_v19 = vpack.c.bf16 %v107_v14, %v101_v13  ;;  %v125_v28 = vld [vmem:[#allocation6 + $0x1a8] sm:$0xff]  ;;  %v131_v29 = vld [vmem:[#allocation6 + $0x1d8] sm:$0xff]  ;;  %v706_v30 = vpack.c.bf16 %v118_v27, %v112_v26  ;;  %v136_v38 = vld [vmem:[#allocation6 + $0x200] sm:$0xff] }
  0x59   :  { %675 = vmatpush1.bf16.msra.mxu1 %v674_v20  ;;  %613 = vmatprep.subr.bf16.mxu0 %v612_v21  ;;  %v100_v20 = vld [vmem:[#allocation6 + $0xe0] sm:$0xff]  ;;  %v106_v21 = vld [vmem:[#allocation6 + $0x110] sm:$0xff]  ;;  %v137_v34 = vld [vmem:[#allocation6 + $0x208] sm:$0xff] }
  0x5a   :  { %677 = vmatprep.subr.bf16.mxu1 %v676_v25  ;;  %v702_v24 = vpack.c.bf16 %v106_v21, %v100_v20  ;;  %v704_v25 = vpack.c.bf16 %v119_v23, %v113_v22  ;;  %v143_v35 = vld [vmem:[#allocation6 + $0x238] sm:$0xff]  ;;  %v142_v39 = vld [vmem:[#allocation6 + $0x230] sm:$0xff]  ;;  %v173_v51 = vld [vmem:[#allocation6 + $0x328] sm:$0xff] }
  0x5b   :  { %v155_v40 = vld [vmem:[#allocation6 + $0x298] sm:$0xff]  ;;  %v714_v41 = vpack.c.bf16 %v142_v39, %v136_v38  ;;  %v166_v50 = vld [vmem:[#allocation6 + $0x2f0] sm:$0xff]  ;;  %v197_v63 = vld [vmem:[#allocation6 + $0x3e8] sm:$0xff] }
  0x5c   :  { %615 = vmatpush1.bf16.msra.mxu0 %v614_v31  ;;  %v708_v31 = vpack.c.bf16 %v131_v29, %v125_v28  ;;  %v167_v46 = vld [vmem:[#allocation6 + $0x2f8] sm:$0xff]  ;;  %v190_v62 = vld [vmem:[#allocation6 + $0x3b0] sm:$0xff]  ;;  %v209_v5 = vld [vmem:[#allocation6 + $0x448] sm:$0xff] }
  0x5d   :  { %679 = vmatpush1.bf16.msra.mxu1 %v678_v32  ;;  %617 = vmatprep.subr.bf16.mxu0 %v616_v33  ;;  %v124_v32 = vld [vmem:[#allocation6 + $0x1a0] sm:$0xff]  ;;  %v130_v33 = vld [vmem:[#allocation6 + $0x1d0] sm:$0xff]  ;;  %v179_v52 = vld [vmem:[#allocation6 + $0x358] sm:$0xff] }
  0x5e   :  { %681 = vmatprep.subr.bf16.mxu1 %v680_v37  ;;  %v710_v36 = vpack.c.bf16 %v130_v33, %v124_v32  ;;  %v712_v37 = vpack.c.bf16 %v143_v35, %v137_v34  ;;  %v724_v54 = vpack.c.bf16 %v179_v52, %v173_v51  ;;  %v191_v58 = vld [vmem:[#allocation6 + $0x3b8] sm:$0xff]  ;;  %v202_v4 = vld [vmem:[#allocation6 + $0x410] sm:$0xff]  ;;  %v221_v12 = vld [vmem:[#allocation6 + $0x4a8] sm:$0xff] }
  0x5f   :  { %v203_v0 = vld [vmem:[#allocation6 + $0x418] sm:$0xff]  ;;  %v214_v11 = vld [vmem:[#allocation6 + $0x470] sm:$0xff]  ;;  %v233_v20 = vld [vmem:[#allocation6 + $0x508] sm:$0xff] }
  0x60   :  { %619 = vmatpush1.bf16.msra.mxu0 %v618_v43  ;;  %v148_v43 = vld [vmem:[#allocation6 + $0x260] sm:$0xff]  ;;  %v215_v6 = vld [vmem:[#allocation6 + $0x478] sm:$0xff]  ;;  %v245_v26 = vld [vmem:[#allocation6 + $0x568] sm:$0xff] }
  0x61   :  { %683 = vmatpush1.bf16.msra.mxu1 %v682_v44  ;;  %621 = vmatprep.subr.bf16.mxu0 %v620_v45  ;;  %v154_v44 = vld [vmem:[#allocation6 + $0x290] sm:$0xff]  ;;  %v161_v45 = vld [vmem:[#allocation6 + $0x2c8] sm:$0xff]  ;;  %v227_v13 = vld [vmem:[#allocation6 + $0x4d8] sm:$0xff] }
  0x62   :  { %685 = vmatprep.subr.bf16.mxu1 %v684_v49  ;;  %v718_v47 = vpack.c.bf16 %v154_v44, %v148_v43  ;;  %v720_v48 = vpack.c.bf16 %v167_v46, %v161_v45  ;;  %v160_v49 = vld [vmem:[#allocation6 + $0x2c0] sm:$0xff]  ;;  %v239_v21 = vld [vmem:[#allocation6 + $0x538] sm:$0xff]  ;;  %v257_v32 = vld [vmem:[#allocation6 + $0x5c8] sm:$0xff] }
  0x63   :  { %v722_v53 = vpack.c.bf16 %v166_v50, %v160_v49  ;;  %v744_v23 = vpack.c.bf16 %v239_v21, %v233_v20  ;;  %v251_v27 = vld [vmem:[#allocation6 + $0x598] sm:$0xff] }
  0x64   :  { %623 = vmatpush1.bf16.msra.mxu0 %v622_v55  ;;  %v172_v55 = vld [vmem:[#allocation6 + $0x320] sm:$0xff]  ;;  %v748_v29 = vpack.c.bf16 %v251_v27, %v245_v26  ;;  %v263_v33 = vld [vmem:[#allocation6 + $0x5f8] sm:$0xff] }
  0x65   :  { %687 = vmatpush1.bf16.msra.mxu1 %v686_v56  ;;  %625 = vmatprep.subr.bf16.mxu0 %v624_v57  ;;  %v178_v56 = vld [vmem:[#allocation6 + $0x350] sm:$0xff]  ;;  %v185_v57 = vld [vmem:[#allocation6 + $0x388] sm:$0xff]  ;;  %v752_v35 = vpack.c.bf16 %v263_v33, %v257_v32 }
  0x66   :  { %689 = vmatprep.subr.bf16.mxu1 %v688_v61  ;;  %v726_v59 = vpack.c.bf16 %v178_v56, %v172_v55  ;;  %v728_v60 = vpack.c.bf16 %v191_v58, %v185_v57  ;;  %v184_v61 = vld [vmem:[#allocation6 + $0x380] sm:$0xff] }
  0x68   :  { %627 = vmatpush1.bf16.msra.mxu0 %v626_v1  ;;  %v730_v1 = vpack.c.bf16 %v190_v62, %v184_v61 }
  0x69   :  { %691 = vmatpush1.bf16.msra.mxu1 %v690_v2  ;;  %693 = vmatprep.subr.bf16.mxu0 %v692_v3  ;;  %v732_v2 = vpack.c.bf16 %v203_v0, %v197_v63 }
  0x6a   :  { %756 = vmatprep.subr.bf16.mxu1 %v692_v3  ;;  %v196_v3 = vld [vmem:[#allocation6 + $0x3e0] sm:$0xff] }
  0x6b   :  { %329 = vmatmul.mubr.f32.vlgmr.msra.gmra.mrb[0].mxu0 %v920_v8  ;;  %v734_v7 = vpack.c.bf16 %v202_v4, %v196_v3 }
  0x6c   :  { %406 = vmatmul.mubr.f32.vlgmr.msra.gmra.mrb[0].mxu1 %v920_v8  ;;  %695 = vmatpush1.bf16.msra.mxu0 %v694_v9 }
  0x6d   :  { %772 = vmatpush1.bf16.msra.mxu1 %v694_v9  ;;  %697 = vmatprep.subr.bf16.mxu0 %v696_v10  ;;  %v736_v9 = vpack.c.bf16 %v215_v6, %v209_v5 }
  0x6e   :  { %757 = vmatprep.subr.bf16.mxu1 %v696_v10  ;;  %334 = vmatprep.mubr.f32.mxu0 %v71_v15  ;;  %v208_v10 = vld [vmem:[#allocation6 + $0x440] sm:$0xff] }
  0x6f   :  { %411 = vmatprep.mubr.f32.mxu1 %v71_v15  ;;  %335 = vmatmul.mubr.f32.gmra.mrb[2].mxu0 %v924_v18  ;;  %v738_v14 = vpack.c.bf16 %v214_v11, %v208_v10 }
  0x70   :  { %699 = vmatpush1.bf16.msra.mxu0 %v698_v17  ;;  %412 = vmatmul.mubr.f32.gmra.mrb[2].mxu1 %v924_v18 }
  0x71   :  { %773 = vmatpush1.bf16.msra.mxu1 %v698_v17  ;;  %701 = vmatprep.subr.bf16.mxu0 %v700_v19  ;;  %v220_v17 = vld [vmem:[#allocation6 + $0x4a0] sm:$0xff] }
  0x72   :  { %758 = vmatprep.subr.bf16.mxu1 %v700_v19  ;;  %482 = vmatprep.mubr.f32.mxu0 %v916_v16  ;;  %v149_v16 = vld [vmem:[#allocation6 + $0x268] sm:$0xff]  ;;  %v226_v19 = vld [vmem:[#allocation6 + $0x4d0] sm:$0xff] }
  0x73   :  { %488 = vmatprep.mubr.f32.mxu1 %v71_v15  ;;  %v716_v42 = vpack.c.bf16 %v155_v40, %v149_v16  ;;  %v740_v15 = vpack.c.bf16 %v227_v13, %v221_v12  ;;  %v742_v22 = vpack.c.bf16 %v226_v19, %v220_v17 }
  0x74   :  { %703 = vmatpush1.bf16.msra.mxu0 %v702_v24 }
  0x75   :  { %774 = vmatpush1.bf16.msra.mxu1 %v702_v24  ;;  %705 = vmatprep.subr.bf16.mxu0 %v704_v25  ;;  %v232_v24 = vld [vmem:[#allocation6 + $0x500] sm:$0xff] }
  0x76   :  { %759 = vmatprep.subr.bf16.mxu1 %v704_v25  ;;  %v238_v25 = vld [vmem:[#allocation6 + $0x530] sm:$0xff] }
  0x77   :  { %v746_v28 = vpack.c.bf16 %v238_v25, %v232_v24 }
  0x78   :  { %707 = vmatpush1.bf16.msra.mxu0 %v706_v30 }
  0x79   :  { %775 = vmatpush1.bf16.msra.mxu1 %v706_v30  ;;  %709 = vmatprep.subr.bf16.mxu0 %v708_v31  ;;  %v244_v30 = vld [vmem:[#allocation6 + $0x560] sm:$0xff] }
  0x7a   :  { %760 = vmatprep.subr.bf16.mxu1 %v708_v31  ;;  %v250_v31 = vld [vmem:[#allocation6 + $0x590] sm:$0xff] }
  0x7b   :  { %v750_v34 = vpack.c.bf16 %v250_v31, %v244_v30 }
  0x7c   :  { %711 = vmatpush1.bf16.msra.mxu0 %v710_v36 }
  0x7d   :  { %776 = vmatpush1.bf16.msra.mxu1 %v710_v36  ;;  %713 = vmatprep.subr.bf16.mxu0 %v712_v37  ;;  %v256_v36 = vld [vmem:[#allocation6 + $0x5c0] sm:$0xff] }
  0x7e   :  { %761 = vmatprep.subr.bf16.mxu1 %v712_v37  ;;  %v262_v37 = vld [vmem:[#allocation6 + $0x5f0] sm:$0xff] }
  0x7f   :  { %v754_v38 = vpack.c.bf16 %v262_v37, %v256_v36 }
  0x80   :  { %715 = vmatpush1.bf16.msra.mxu0 %v714_v41 }
  0x81   :  { %777 = vmatpush1.bf16.msra.mxu1 %v714_v41  ;;  %717 = vmatprep.subr.bf16.mxu0 %v716_v42 }
  0x82   :  { %762 = vmatprep.subr.bf16.mxu1 %v716_v42 }
  0x84   :  { %719 = vmatpush1.bf16.msra.mxu0 %v718_v47 }
  0x85   :  { %778 = vmatpush1.bf16.msra.mxu1 %v718_v47  ;;  %721 = vmatprep.subr.bf16.mxu0 %v720_v48 }
  0x86   :  { %763 = vmatprep.subr.bf16.mxu1 %v720_v48 }
  0x88   :  { %723 = vmatpush1.bf16.msra.mxu0 %v722_v53 }
  0x89   :  { %779 = vmatpush1.bf16.msra.mxu1 %v722_v53  ;;  %725 = vmatprep.subr.bf16.mxu0 %v724_v54 }
  0x8a   :  { %764 = vmatprep.subr.bf16.mxu1 %v724_v54 }
  0x8c   :  { %727 = vmatpush1.bf16.msra.mxu0 %v726_v59 }
  0x8d   :  { %780 = vmatpush1.bf16.msra.mxu1 %v726_v59  ;;  %729 = vmatprep.subr.bf16.mxu0 %v728_v60 }
  0x8e   :  { %765 = vmatprep.subr.bf16.mxu1 %v728_v60 }
  0x90   :  { %731 = vmatpush1.bf16.msra.mxu0 %v730_v1 }
  0x91   :  { %781 = vmatpush1.bf16.msra.mxu1 %v730_v1  ;;  %733 = vmatprep.subr.bf16.mxu0 %v732_v2 }
  0x92   :  { %766 = vmatprep.subr.bf16.mxu1 %v732_v2 }
  0x94   :  { %735 = vmatpush1.bf16.msra.mxu0 %v734_v7 }
  0x95   :  { %782 = vmatpush1.bf16.msra.mxu1 %v734_v7  ;;  %737 = vmatprep.subr.bf16.mxu0 %v736_v9 }
  0x96   :  { %767 = vmatprep.subr.bf16.mxu1 %v736_v9 }
  0x98   :  { %739 = vmatpush1.bf16.msra.mxu0 %v738_v14 }
  0x99   :  { %783 = vmatpush1.bf16.msra.mxu1 %v738_v14  ;;  %741 = vmatprep.subr.bf16.mxu0 %v740_v15 }
  0x9a   :  { %768 = vmatprep.subr.bf16.mxu1 %v740_v15 }
  0x9c   :  { %743 = vmatpush1.bf16.msra.mxu0 %v742_v22 }
  0x9d   :  { %784 = vmatpush1.bf16.msra.mxu1 %v742_v22  ;;  %745 = vmatprep.subr.bf16.mxu0 %v744_v23 }
  0x9e   :  { %769 = vmatprep.subr.bf16.mxu1 %v744_v23 }
  0xa0   :  { %747 = vmatpush1.bf16.msra.mxu0 %v746_v28 }
  0xa1   :  { %785 = vmatpush1.bf16.msra.mxu1 %v746_v28  ;;  %749 = vmatprep.subr.bf16.mxu0 %v748_v29 }
  0xa2   :  { %770 = vmatprep.subr.bf16.mxu1 %v748_v29 }
  0xa4   :  { %751 = vmatpush1.bf16.msra.mxu0 %v750_v34 }
  0xa5   :  { %786 = vmatpush1.bf16.msra.mxu1 %v750_v34  ;;  %753 = vmatprep.subr.bf16.mxu0 %v752_v35 }
  0xa6   :  { %771 = vmatprep.subr.bf16.mxu1 %v752_v35 }
  0xa8   :  { %755 = vmatpush1.bf16.msra.mxu0 %v754_v38 }
  0xa9   :  { %787 = vmatpush1.bf16.msra.mxu1 %v754_v38 }
  0xab   :  { %483 = vmatmul.mubr.f32.vlgmr.msra.gmra.mrb[4].mxu0 %v920_v8 }
  0xac   :  { %489 = vmatmul.mubr.f32.vlgmr.msra.gmra.mrb[4].mxu1 %v924_v18 }
 0x13e   :  { %v330_v39 = vpop.f32.mrb[0].mxu0 }
 0x13f   :  { %534 = vst [vmem:[#allocation8] sm:$0xff] %v330_v39  ;;  %v407_v16 = vpop.f32.mrb[0].mxu1  ;;  %v332_v40 = vpop.f32.mrb[1].mxu0 }
 0x140   :  { %536 = vst [vmem:[#allocation8 + $0x10] sm:$0xff] %v407_v16  ;;  %535 = vst [vmem:[#allocation8 + $0x8] sm:$0xff] %v332_v40  ;;  %v409_v41 = vpop.f32.mrb[1].mxu1 }
 0x141   :  { %537 = vst [vmem:[#allocation8 + $0x18] sm:$0xff] %v409_v41 }
 0x142   :  { %v336_v42 = vpop.f32.mrb[2].mxu0 }
 0x143   :  { %540 = vst [vmem:[#allocation8 + $0x30] sm:$0xff] %v336_v42  ;;  %v413_v43 = vpop.f32.mrb[2].mxu1  ;;  %v338_v44 = vpop.f32.mrb[3].mxu0 }
 0x144   :  { %542 = vst [vmem:[#allocation8 + $0x40] sm:$0xff] %v413_v43  ;;  %541 = vst [vmem:[#allocation8 + $0x38] sm:$0xff] %v338_v44  ;;  %v415_v45 = vpop.f32.mrb[3].mxu1 }
 0x145   :  { %543 = vst [vmem:[#allocation8 + $0x48] sm:$0xff] %v415_v45 }
 0x17e   :  { %v484_v8 = vpop.f32.mrb[4].mxu0 }
 0x17f   :  { %538 = vst [vmem:[#allocation8 + $0x20] sm:$0xff] %v484_v8  ;;  %v490_v18 = vpop.f32.mrb[4].mxu1  ;;  %v486_v46 = vpop.f32.mrb[5].mxu0 }
 0x180   :  { %544 = vst [vmem:[#allocation8 + $0x50] sm:$0xff] %v490_v18  ;;  %539 = vst [vmem:[#allocation8 + $0x28] sm:$0xff] %v486_v46  ;;  %v492_v47 = vpop.f32.mrb[5].mxu1 }
 0x181   :  { %545 = vst [vmem:[#allocation8 + $0x58] sm:$0xff] %v492_v47 }
 0x182   :  { %850 = shalt.err (!%p847_p6)
}
 0x183   :  { %s851_s12 = scalar_lea.hbm %s948_s2, 1536 }
 0x184   :  { %p852_p7 = scmp.ne.s32.totalorder %s948_s2, %s851_s12  ;;  %p855_p8 = scmp.lt.u32.totalorder %s851_s12, %s948_s2 }
 0x186   :  { %p857_p9 = pnand %p855_p8, %p852_p7 }
 0x188   :  { %860 = shalt.err (!%p857_p9)
}
 0x189   :  { %557 = dma.vmem_to_hbm [thread:$0]  %s552_s8, 1536, %s948_s2, [#allocation5], %s871_s0, %s871_s0, %s872_s5  }
 0x18a   :  { %865 = dma.done.wait [#allocation5], 1536  }
 0x18b   :  { %866 = vsyncadd [#allocation5], 4294965760 }
 0x18c   :  { %561 = vsyncpa [#allocation4], 1 }
 0x18d   :  { %562 = vsyncpa [#allocation7], 1 }
 0x18e   :  { %563 = vsyncpa [#allocation5], 1 }

</bundles_post_ra>
